<compile_context>
chip_gen: v7x
topology: tpu7x:2x2x1
jax: 0.10.0
libtpu: 0.0.40
codegen_flags: <defaults>
</compile_context>

<pallas_src>
import functools

import jax
import jax.numpy as jnp
from jax.experimental import pallas as pl
from jax.experimental.pallas import tpu as pltpu


def _round_up(x, m):
    return ((x + m - 1) // m) * m


def _vmem_capacity_bytes():
    """Per-core VMEM capacity; conservative (v7x, 64 MiB) fallback."""
    try:
        info = pltpu.get_tpu_info()
        cap = getattr(info, "vmem_capacity_bytes", None)
        if cap:
            return int(cap)
    except Exception:
        pass
    return 64 << 20


def _largest_aligned_divisor(n, cap, align):
    """Largest divisor of n that is a multiple of `align` and <= cap.

    n must itself be a multiple of `align`.  cap >= align assumed.
    """
    best = align
    d = align
    limit = min(n, cap)
    while d <= limit:
        if n % d == 0:
            best = d
        d += align
    return best


# ---------------------------------------------------------------------------
# Kernels
# ---------------------------------------------------------------------------


def _fused_kernel(x_ref, w_ref, b_ref, o_ref, *, mxu_dtype):
    """Whole K/N resident in VMEM; one (tm, Np) output tile per grid step."""
    x = x_ref[...]
    w = w_ref[...]
    if mxu_dtype is not None:
        x = x.astype(mxu_dtype)          # in-kernel cast: rides a free VPU slot
        if w.dtype != mxu_dtype:
            w = w.astype(mxu_dtype)
    acc = jnp.dot(x, w, preferred_element_type=jnp.float32)
    o_ref[...] = (acc + b_ref[...]).astype(o_ref.dtype)


def _tiled_kernel_f32out(x_ref, w_ref, b_ref, o_ref, *, mxu_dtype):
    """3-D tiled fallback, f32 output: accumulate directly into o_ref."""
    k = pl.program_id(2)

    @pl.when(k == 0)
    def _():
        o_ref[...] = jnp.zeros_like(o_ref)

    x = x_ref[...]
    w = w_ref[...]
    if mxu_dtype is not None:
        x = x.astype(mxu_dtype)
        if w.dtype != mxu_dtype:
            w = w.astype(mxu_dtype)
    o_ref[...] += jnp.dot(x, w, preferred_element_type=jnp.float32)

    @pl.when(k == pl.num_programs(2) - 1)
    def _():
        o_ref[...] = o_ref[...] + b_ref[...]


def _tiled_kernel_acc(x_ref, w_ref, b_ref, o_ref, acc_ref, *, mxu_dtype):
    """3-D tiled fallback with an f32 VMEM accumulator (non-f32 outputs)."""
    k = pl.program_id(2)

    @pl.when(k == 0)
    def _():
        acc_ref[...] = jnp.zeros_like(acc_ref)

    x = x_ref[...]
    w = w_ref[...]
    if mxu_dtype is not None:
        x = x.astype(mxu_dtype)
        if w.dtype != mxu_dtype:
            w = w.astype(mxu_dtype)
    acc_ref[...] += jnp.dot(x, w, preferred_element_type=jnp.float32)

    @pl.when(k == pl.num_programs(2) - 1)
    def _():
        o_ref[...] = (acc_ref[...] + b_ref[...]).astype(o_ref.dtype)


# ---------------------------------------------------------------------------
# Wrappers
# ---------------------------------------------------------------------------


def prepare_logreg_params(w_t, b, *, mxu_dtype=jnp.bfloat16):
    """One-time pad (K,N -> multiples of 128) and optional bf16 cast of params.

    Call once at parameter-setup time so the per-forward path never touches
    the weights with jnp.pad/astype again.
    """
    hid_dim, out_dim = w_t.shape
    kp = _round_up(hid_dim, 128)
    np_ = _round_up(out_dim, 128)
    b = jnp.reshape(b, (1, -1)).astype(jnp.float32)
    if (kp, np_) != (hid_dim, out_dim):
        w_t = jnp.pad(w_t, ((0, kp - hid_dim), (0, np_ - out_dim)))
        b = jnp.pad(b, ((0, 0), (0, np_ - out_dim)))
    if mxu_dtype is not None:
        w_t = w_t.astype(mxu_dtype)
    return w_t, b


def logreg_forward(x, w_t, b, *, out_dim=None, mxu_dtype=jnp.bfloat16,
                   tm=512, tn=512, tk=None):
    """y = x @ w_t + b  (PyTorch nn.Linear forward).

    x:   (batch, hid_dim)
    w_t: (hid_dim, out_dim) or the pre-padded output of prepare_logreg_params
    b:   (out_dim,) / (1, out_dim) or its pre-padded counterpart
    out_dim: true number of classes (needed only when params are pre-padded)
    mxu_dtype: MXU input dtype (bf16 default; None = exact f32 path)
    """
    batch, hid_dim = x.shape
    k_w, n_w = w_t.shape
    assert k_w >= hid_dim, "w_t first dim must cover hid_dim"
    b = jnp.reshape(b, (1, -1))
    assert b.shape[1] == n_w
    if out_dim is None:
        out_dim = n_w
    out_dtype = x.dtype

    # Align only to hardware granularity (8 sublanes, 128 lanes).
    mp = _round_up(batch, 8)
    kp = _round_up(k_w, 128)
    np_ = _round_up(n_w, 128)

    # Parameter padding only if the caller did not pre-pad (zero K pad = exact).
    if (k_w, n_w) != (kp, np_):
        w_t = jnp.pad(w_t, ((0, kp - k_w), (0, np_ - n_w)))
        b = jnp.pad(b, ((0, 0), (0, np_ - n_w)))
    b = b.astype(jnp.float32)

    # Activation padding only when needed.
    if (batch, hid_dim) != (mp, kp):
        x = jnp.pad(x, ((0, mp - batch), (0, kp - hid_dim)))

    x_isz = jnp.dtype(x.dtype).itemsize
    w_isz = jnp.dtype(w_t.dtype).itemsize
    o_isz = jnp.dtype(out_dtype).itemsize

    vmem_cap = _vmem_capacity_bytes()
    vmem_budget = int(0.6 * vmem_cap)          # ~38 MiB v7x, ~76 MiB v5e/v6e
    if tk is None:
        tk = 2048 if vmem_cap >= (96 << 20) else 1024   # bigger K tiles on 128 MiB parts

    # ------------------------------------------------------------------
    # Primary path: whole weight slab + bias resident, 1-D grid over M.
    # ------------------------------------------------------------------
    def fused_bytes(tm_):
        return (2 * tm_ * kp * x_isz        # double-buffered x tile
                + kp * np_ * w_isz          # resident weight slab
                + np_ * 4                   # resident bias
                + 2 * tm_ * np_ * o_isz)    # double-buffered output tile

    tm_f = _largest_aligned_divisor(mp, min(tm, 512), 8)
    if mp >= 16 and mp // tm_f < 2:
        # v7x has 2 TensorCores: make sure the parallel grid has >= 2 tiles.
        tm_f = _largest_aligned_divisor(mp, mp // 2, 8)
    while fused_bytes(tm_f) > vmem_budget and tm_f > 8:
        tm_f = _largest_aligned_divisor(mp, tm_f - 8, 8)
    use_fused = fused_bytes(tm_f) <= vmem_budget

    if use_fused:
        vmem_limit = min(max(int(1.25 * fused_bytes(tm_f)), 16 << 20),
                         int(0.7 * vmem_cap))
        y_pad = pl.pallas_call(
            functools.partial(_fused_kernel, mxu_dtype=mxu_dtype),
            out_shape=jax.ShapeDtypeStruct((mp, np_), out_dtype),
            grid_spec=pltpu.PrefetchScalarGridSpec(
                num_scalar_prefetch=0,
                grid=(mp // tm_f,),
                in_specs=[
                    pl.BlockSpec((tm_f, kp), lambda i: (i, 0)),
                    pl.BlockSpec((kp, np_), lambda i: (0, 0)),
                    pl.BlockSpec((1, np_), lambda i: (0, 0)),
                ],
                out_specs=pl.BlockSpec((tm_f, np_), lambda i: (i, 0)),
            ),
            compiler_params=pltpu.CompilerParams(
                dimension_semantics=("parallel",),
                vmem_limit_bytes=vmem_limit,
            ),
        )(x, w_t, b)
    else:
        # --------------------------------------------------------------
        # Fallback: 3-D tiled matmul with K-innermost accumulation.
        # --------------------------------------------------------------
        tm_t = _largest_aligned_divisor(mp, tm, 8)
        tn_t = _largest_aligned_divisor(np_, tn, 128)
        tk_t = _largest_aligned_divisor(kp, tk, 128)

        def tiled_bytes(tm_, tn_, tk_):
            return (2 * tm_ * tk_ * x_isz + 2 * tk_ * tn_ * w_isz
                    + 2 * tn_ * 4 + 2 * tm_ * tn_ * o_isz + tm_ * tn_ * 4)

        while tiled_bytes(tm_t, tn_t, tk_t) > vmem_budget and tk_t > 128:
            tk_t = _largest_aligned_divisor(kp, tk_t - 128, 128)
        while tiled_bytes(tm_t, tn_t, tk_t) > vmem_budget and tn_t > 128:
            tn_t = _largest_aligned_divisor(np_, tn_t - 128, 128)
        while tiled_bytes(tm_t, tn_t, tk_t) > vmem_budget and tm_t > 8:
            tm_t = _largest_aligned_divisor(mp, tm_t - 8, 8)

        vmem_limit = min(max(int(1.25 * tiled_bytes(tm_t, tn_t, tk_t)), 16 << 20),
                         int(0.7 * vmem_cap))
        grid = (mp // tm_t, np_ // tn_t, kp // tk_t)

        if out_dtype == jnp.float32:
            kernel = functools.partial(_tiled_kernel_f32out, mxu_dtype=mxu_dtype)
            scratch = []
        else:
            kernel = functools.partial(_tiled_kernel_acc, mxu_dtype=mxu_dtype)
            scratch = [pltpu.VMEM((tm_t, tn_t), jnp.float32)]

        y_pad = pl.pallas_call(
            kernel,
            out_shape=jax.ShapeDtypeStruct((mp, np_), out_dtype),
            grid_spec=pltpu.PrefetchScalarGridSpec(
                num_scalar_prefetch=0,
                grid=grid,
                in_specs=[
                    pl.BlockSpec((tm_t, tk_t), lambda i, j, k: (i, k)),
                    pl.BlockSpec((tk_t, tn_t), lambda i, j, k: (k, j)),
                    pl.BlockSpec((1, tn_t), lambda i, j, k: (0, j)),
                ],
                out_specs=pl.BlockSpec((tm_t, tn_t), lambda i, j, k: (i, j)),
                scratch_shapes=scratch,
            ),
            compiler_params=pltpu.CompilerParams(
                dimension_semantics=("parallel", "parallel", "arbitrary"),
                vmem_limit_bytes=vmem_limit,
            ),
        )(x, w_t, b)

    # Skip the slice when the padded slab already matches the logical output.
    if (mp, np_) == (batch, out_dim):
        return y_pad
    return y_pad[:batch, :out_dim]


def init_logreg_params(key, hid_dim, out_dim, dtype=jnp.float32):
    """Deterministic init mimicking nn.Linear default (uniform +-1/sqrt(hid))."""
    kw, kb = jax.random.split(key)
    bound = 1.0 / jnp.sqrt(jnp.float32(hid_dim))
    # PyTorch stores weight as (out_dim, hid_dim); we keep the transpose.
    weight = jax.random.uniform(kw, (out_dim, hid_dim), dtype, -bound, bound)
    bias = jax.random.uniform(kb, (out_dim,), dtype, -bound, bound)
    return weight.T, bias


if __name__ == "__main__":
    key = jax.random.PRNGKey(0)
    k_x, k_p = jax.random.split(key)

    batch, hid_dim, out_dim = 8, 32, 16
    x = jax.random.normal(k_x, (batch, hid_dim), dtype=jnp.float32)
    w_t, b = init_logreg_params(k_p, hid_dim, out_dim)

    y_ref = x @ w_t + b.reshape(1, -1)

    # Path 1 (default): bf16 MXU inputs, params pre-padded/pre-cast once.
    w_prep, b_prep = prepare_logreg_params(w_t, b, mxu_dtype=jnp.bfloat16)
    y_bf16 = logreg_forward(x, w_prep, b_prep, out_dim=out_dim,
                            mxu_dtype=jnp.bfloat16)
    y_bf16 = jax.block_until_ready(y_bf16)
    assert y_bf16.shape == (batch, out_dim)
    # bf16 MXU inputs -> looser tolerance vs. the f32 reference.
    assert jnp.allclose(y_bf16, y_ref, atol=2e-2, rtol=2e-2)

    # Path 2: exact f32 path straight from raw (unpadded) params.
    y_f32 = logreg_forward(x, w_t, b, mxu_dtype=None)
    y_f32 = jax.block_until_ready(y_f32)
    assert y_f32.shape == (batch, out_dim)
    assert jnp.allclose(y_f32, y_ref, atol=1e-5, rtol=1e-5)

    print("KERNEL_OK")
</pallas_src>

<mosaic_0001>
module attributes {stable_mosaic.version = 11 : i64} {
  func.func @_fused_kernel(%arg0: i32, %arg1: memref<8x128xf32, #tpu.memory_space<vmem>>, %arg2: memref<128x128xbf16, #tpu.memory_space<vmem>>, %arg3: memref<1x128xf32, #tpu.memory_space<vmem>>, %arg4: memref<8x128xf32, #tpu.memory_space<vmem>>) attributes {dimension_semantics = [#tpu.dimension_semantics<parallel>], iteration_bounds = array<i64: 1>, scalar_prefetch = 0 : i64, scratch_operands = 0 : i64, tpu.core_type = #tpu.core_type<tc>, window_params = [{transform_indices = @transform_0, window_bounds = array<i64: 8, 128>}, {pipeline_mode = #tpu.pipeline_mode<synchronous>, transform_indices = @transform_1, window_bounds = array<i64: 128, 128>}, {pipeline_mode = #tpu.pipeline_mode<synchronous>, transform_indices = @transform_2, window_bounds = array<i64: 1, 128>}, {transform_indices = @transform_3, window_bounds = array<i64: 8, 128>}]} {
    %c0 = arith.constant 0 : index
    %c0_0 = arith.constant 0 : index
    %0 = vector.load %arg1[%c0, %c0_0] : memref<8x128xf32, #tpu.memory_space<vmem>>, vector<8x128xf32>
    %c0_1 = arith.constant 0 : index
    %c0_2 = arith.constant 0 : index
    %1 = vector.load %arg2[%c0_1, %c0_2] : memref<128x128xbf16, #tpu.memory_space<vmem>>, vector<128x128xbf16>
    %2 = arith.truncf %0 : vector<8x128xf32> to vector<8x128xbf16>
    %cst = arith.constant dense<0.000000e+00> : vector<8x128xf32>
    %3 = tpu.matmul %2, %1, %cst {dimension_numbers = #tpu.dot_dimension_numbers<[1], [0], [0], [1], [0, 0, 1, 1], [], []>} : vector<8x128xbf16>, vector<128x128xbf16>, vector<8x128xf32> -> vector<8x128xf32>
    %c0_3 = arith.constant 0 : index
    %c0_4 = arith.constant 0 : index
    %4 = vector.load %arg3[%c0_3, %c0_4] : memref<1x128xf32, #tpu.memory_space<vmem>>, vector<1x128xf32>
    %5 = vector.broadcast %4 : vector<1x128xf32> to vector<8x128xf32>
    %6 = arith.addf %3, %5 : vector<8x128xf32>
    %c0_5 = arith.constant 0 : index
    %c0_6 = arith.constant 0 : index
    %7 = vector.load %arg4[%c0_5, %c0_6] : memref<8x128xf32, #tpu.memory_space<vmem>>, vector<8x128xf32>
    tpu.vector_store %arg4[%c0_5, %c0_6], %6 {strides = array<i32>} : memref<8x128xf32, #tpu.memory_space<vmem>>, vector<8x128xf32>,
    return
  }
  func.func @transform_0(%arg0: i32) -> (i32, i32) {
    %c0_i32 = arith.constant 0 : i32
    %c0_i32_0 = arith.constant 0 : i32
    return %arg0, %c0_i32 : i32, i32
  }
  func.func @transform_1(%arg0: i32) -> (i32, i32) {
    %c0_i32 = arith.constant 0 : i32
    %c0_i32_0 = arith.constant 0 : i32
    %c0_i32_1 = arith.constant 0 : i32
    return %c0_i32, %c0_i32_0 : i32, i32
  }
  func.func @transform_2(%arg0: i32) -> (i32, i32) {
    %c0_i32 = arith.constant 0 : i32
    %c0_i32_0 = arith.constant 0 : i32
    %c0_i32_1 = arith.constant 0 : i32
    return %c0_i32, %c0_i32_0 : i32, i32
  }
  func.func @transform_3(%arg0: i32) -> (i32, i32) {
    %c0_i32 = arith.constant 0 : i32
    %c0_i32_0 = arith.constant 0 : i32
    return %arg0, %c0_i32 : i32, i32
  }
}

</mosaic_0001>

<bundles_post_ra>
// kernel: tpu_custom_call.1
= control target key start
LH: loop header
LB: loop body
LE: loop exit
PB: predicated region body
PF: predicated region fallthrough
CT: control target
= control target key end

     0   :  { %8 = vsyncpa [#allocation3], 0  ;;  %s370_s0 = inlined_call_operand.hbm [shape: f32[8,128], index: 0, kind: input, shape index: {}]   ;;  %s371_s1 = inlined_call_operand.hbm [shape: bf16[128,128], index: 1, kind: input, shape index: {}]   ;;  %s372_s2 = inlined_call_operand.vmem [shape: f32[1,128], index: 2, kind: input, shape index: {}]   ;;  %s373_s3 = inlined_call_operand.hbm [shape: f32[8,128], index: 3, kind: output, shape index: {}]  }
   0x1   :  { %9 = vsyncpa [#allocation6], 0 }
   0x2   :  { %10 = vsyncpa [#allocation4], 0  ;;  %s297_s12 = smov [#allocation2]   ;;  %s298_s14 = smov [#allocation5]  }
   0x3   :  { %s17_s13 = sshll.u32 %s297_s12, 4  ;;  %s26_s15 = sshll.u32 %s298_s14, 4  ;;  %s18_s13 = int_to_ptr.vmem [resolvable:$true] %s17_s13  ;;  %s324_s15 = int_to_ptr.vmem [resolvable:$true] %s26_s15 }
   0x4   :  { %s225_s18 = scalar_lea.hbm %s370_s0, 128 }
   0x5   :  { %p226_p0 = scmp.ne.s32.totalorder %s370_s0, %s225_s18  ;;  %p229_p1 = scmp.lt.u32.totalorder %s225_s18, %s370_s0 }
   0x7   :  { %p231_p2 = pnand %p229_p1, %p226_p0 }
   0x9   :  { %234 = shalt.err (!%p231_p2)
}
   0xa   :  { %s235_s23 = scalar_lea.vmem %s18_s13, 128  ;;  %p240_p4 = scmp.lt.s32.totalorder %s18_s13, %s18_s13 }
   0xb   :  { %p236_p3 = scmp.ne.s32.totalorder %s18_s13, %s235_s23  ;;  %p241_p5 = scmp.lt.s32.totalorder %s235_s23, %s235_s23 }
   0xd   :  { %p242_p6 = por %p241_p5, %p240_p4 }
   0xf   :  { %p243_p7 = pnand %p242_p6, %p236_p3 }
  0x11   :  { %246 = shalt.err (!%p243_p7)
}
  0x12   :  { %20 = dma.hbm_to_vmem [thread:$0]  %s370_s0, 128, %s18_s13, [#allocation3]  }
  0x13   :  { %s247_s28 = scalar_lea.hbm %s371_s1, 1024 }
  0x14   :  { %p248_p8 = scmp.ne.s32.totalorder %s371_s1, %s247_s28  ;;  %p251_p9 = scmp.lt.u32.totalorder %s247_s28, %s371_s1 }
  0x16   :  { %p253_p10 = pnand %p251_p9, %p248_p8 }
  0x18   :  { %256 = shalt.err (!%p253_p10)
}
  0x19   :  { %s257_s6 = scalar_lea.vmem %s324_s15, 1024  ;;  %p262_p12 = scmp.lt.s32.totalorder %s324_s15, %s324_s15 }
  0x1a   :  { %p258_p11 = scmp.ne.s32.totalorder %s324_s15, %s257_s6  ;;  %p263_p13 = scmp.lt.s32.totalorder %s257_s6, %s257_s6 }
  0x1c   :  { %p264_p0 = por %p263_p13, %p262_p12 }
  0x1e   :  { %p265_p1 = pnand %p264_p0, %p258_p11 }
  0x20   :  { %268 = shalt.err (!%p265_p1)
}
  0x21   :  { %s299_s0 = smov 64   ;;  %s300_s7 = smov 4  }
  0x22   :  { %32 = dma.hbm_to_vmem [thread:$0]  %s371_s1, 1024, %s324_s15, [#allocation6], %s299_s0, %s299_s0, %s300_s7  }
  0x23   :  { %291 = dma.done.wait [#allocation3], 128  }
  0x24   :  { %292 = vsyncadd [#allocation3], 4294967168 }
  0x25   :  { %293 = dma.done.wait [#allocation6], 1024  }
  0x26   :  { %294 = vsyncadd [#allocation6], 4294966272  ;;  %v301_v0 = vmov 0.0   ;;  %vm302_vm0 = vmmov 0   ;;  %v217_v1 = vld [vmem:[#allocation5] sm:$0xff]   ;;  %v218_v2 = vld [vmem:[#allocation5 + $0x8] sm:$0xff]  }
  0x27   :  { %190 = vmatprep.subr.bf16.mxu0 %v301_v0  ;;  %206 = vmatprep.mubr.msk.bf16.mxu0 %vm302_vm0, %v301_v0  ;;  %v219_v3 = vld [vmem:[#allocation5 + $0x10] sm:$0xff]   ;;  %v220_v4 = vld [vmem:[#allocation5 + $0x18] sm:$0xff]   ;;  %v221_v5 = vld [vmem:[#allocation5 + $0x20] sm:$0xff]   ;;  %s303_s11 = smov [#allocation7]  }
  0x28   :  { %191 = vmatpush3.bf16.msra.mxu0 %v217_v1  ;;  %v222_v6 = vld [vmem:[#allocation5 + $0x28] sm:$0xff]   ;;  %v223_v7 = vld [vmem:[#allocation5 + $0x30] sm:$0xff]   ;;  %v224_v8 = vld [vmem:[#allocation5 + $0x38] sm:$0xff]   ;;  %s162_s12 = sshll.u32 %s303_s11, 4  ;;  %s163_s12 = int_to_ptr.vmem [resolvable:$true] %s162_s12 }
  0x29   :  { %192 = vmatprep.subr.bf16.mxu0 %v301_v0  ;;  %v42_v9 = vld [vmem:[#allocation2] sm:$0xff]  ;;  %s269_s13 = scalar_lea.vmem %s163_s12, 128  ;;  %p274_p3 = scmp.lt.s32.totalorder %s163_s12, %s163_s12 }
  0x2a   :  { %v59_v10 = vpack.c.bf16 %v42_v9, %v42_v9  ;;  %v172_v11 = vld [vmem:[%s372_s2] ss:$0 sm:$0xff]  ;;  %p270_p2 = scmp.ne.s32.totalorder %s163_s12, %s269_s13  ;;  %p275_p4 = scmp.lt.s32.totalorder %s269_s13, %s269_s13 }
  0x2c   :  { %193 = vmatpush3.bf16.msra.mxu0 %v218_v2  ;;  %p276_p5 = por %p275_p4, %p274_p3 }
  0x2d   :  { %194 = vmatprep.subr.bf16.mxu0 %v301_v0 }
  0x2e   :  { %p277_p6 = pnand %p276_p5, %p270_p2 }
  0x30   :  { %195 = vmatpush3.bf16.msra.mxu0 %v219_v3 }
  0x31   :  { %196 = vmatprep.subr.bf16.mxu0 %v301_v0 }
  0x34   :  { %197 = vmatpush3.bf16.msra.mxu0 %v220_v4 }
  0x35   :  { %198 = vmatprep.subr.bf16.mxu0 %v301_v0 }
  0x38   :  { %199 = vmatpush3.bf16.msra.mxu0 %v221_v5 }
  0x39   :  { %200 = vmatprep.subr.bf16.mxu0 %v301_v0 }
  0x3c   :  { %201 = vmatpush3.bf16.msra.mxu0 %v222_v6 }
  0x3d   :  { %202 = vmatprep.subr.bf16.mxu0 %v301_v0 }
  0x40   :  { %203 = vmatpush3.bf16.msra.mxu0 %v223_v7 }
  0x41   :  { %204 = vmatprep.subr.bf16.mxu0 %v301_v0 }
  0x44   :  { %205 = vmatpush3.bf16.msra.mxu0 %v224_v8 }
  0x47   :  { %207 = vmatmul.mubr.bf16.vlgmr.msra.gmra.mrb[0].mxu0 %v59_v10 }
 0x11a   :  { %v149_v12 = vpop.f32.mrb[0].mxu0 }
 0x11b   :  { %v150_v13 = vadd.f32 %v172_v11, %v149_v12  ;;  %v208_v14 = vpop.f32.mrb[1].mxu0 }
 0x11c   :  { %v152_v15 = vpop.f32.mrb[2].mxu0 }
 0x11d   :  { %155 = vst [vmem:[#allocation7] sm:$0xff] %v150_v13  ;;  %v209_v16 = vpop.f32.mrb[3].mxu0 }
 0x11e   :  { %280 = shalt.err (!%p277_p6)
}
 0x11f   :  { %s281_s2 = scalar_lea.hbm %s373_s3, 128 }
 0x120   :  { %p282_p7 = scmp.ne.s32.totalorder %s373_s3, %s281_s2  ;;  %p285_p8 = scmp.lt.u32.totalorder %s281_s2, %s373_s3 }
 0x122   :  { %p287_p9 = pnand %p285_p8, %p282_p7 }
 0x124   :  { %290 = shalt.err (!%p287_p9)
}
 0x125   :  { %165 = dma.vmem_to_hbm [thread:$0]  %s163_s12, 128, %s373_s3, [#allocation4]  }
 0x126   :  { %295 = dma.done.wait [#allocation4], 128  }
 0x127   :  { %296 = vsyncadd [#allocation4], 4294967168 }
 0x128   :  { %169 = vsyncpa [#allocation3], 1 }
 0x129   :  { %170 = vsyncpa [#allocation6], 1 }
 0x12a   :  { %171 = vsyncpa [#allocation4], 1 }

</bundles_post_ra>
